<compile_context>
chip_gen: v5e
topology: v5e:2x2
jax: 0.10.0
libtpu: 0.0.40
codegen_flags: <defaults>
</compile_context>

<pallas_src>
import math

import jax
import jax.numpy as jnp
from jax.experimental import pallas as pl
from jax.experimental.pallas import tpu as pltpu

BN_EPS = 1e-5
NEG_INF = -1e30


def _round_up(n, m):
    return ((n + m - 1) // m) * m


def _vmem_budget():
    """Generation-aware (vmem_limit_bytes, default_batch_tile)."""
    try:
        cap = int(pltpu.get_tpu_info().vmem_capacity_bytes)
    except Exception:
        cap = 64 * 1024 * 1024
    if cap >= 96 * 1024 * 1024:          # v5e / v6e: 128 MiB physical VMEM
        return 100 * 1024 * 1024, 512
    return 52 * 1024 * 1024, 256         # v7x: 64 MiB physical VMEM


# --------------------------------------------------------------------------------------
# Pass 1: per-tile partial BatchNorm statistics of h1 = x @ W1 (bias omitted; it cancels
# exactly in train-mode BN and its omission makes zero-padded batch rows contribute 0).
# Output block rows: [0] = column sums, [1] = column sums of squares, [2:8] = 0.
# --------------------------------------------------------------------------------------
def _bn_stats_kernel(x_ref, w1_ref, stats_ref):
    h = jnp.dot(x_ref[...], w1_ref[...], preferred_element_type=jnp.float32)
    s = jnp.sum(h, axis=0, keepdims=True)          # (1, Hp)
    ss = jnp.sum(h * h, axis=0, keepdims=True)     # (1, Hp)
    row = jax.lax.broadcasted_iota(jnp.int32, stats_ref.shape, 0)
    stats_ref[...] = jnp.where(row == 0, s, jnp.where(row == 1, ss, 0.0))


# --------------------------------------------------------------------------------------
# Pass 2: per batch tile -- recompute h1, apply folded BN affine + ReLU, MLP, softmax.
# --------------------------------------------------------------------------------------
def _mlp_kernel(scale_ref, shift_ref, x_ref,
                w1_ref, w2_ref, b2_ref, w3_ref, b3_ref, w4_ref, b4_ref,
                out_ref):
    bf16 = jnp.bfloat16

    # bottleneck: Linear(E -> 2E) + BatchNorm (batch stats, gamma=1/beta=0) + ReLU.
    # bias / mean / rstd are pre-folded into (scale, shift) in the wrapper.
    # TODO(synk): for very large E (Ep >~ 2k on v5e/v6e), spill h1 as bf16 from pass 1
    # instead of recomputing x @ W1 here (recompute wins below that roofline crossover).
    h = jnp.dot(x_ref[...], w1_ref[...], preferred_element_type=jnp.float32)
    h = jnp.maximum(h * scale_ref[...] + shift_ref[...], 0.0)

    # classifier: Linear(2E -> E) + ReLU
    h = jnp.maximum(
        jnp.dot(h.astype(bf16), w2_ref[...],
                preferred_element_type=jnp.float32) + b2_ref[...], 0.0)

    # classifier: Linear(E -> E) + ReLU
    h = jnp.maximum(
        jnp.dot(h.astype(bf16), w3_ref[...],
                preferred_element_type=jnp.float32) + b3_ref[...], 0.0)

    # classifier: Linear(E -> num_class). Padded classes get b4 = -1e30 -> exp() == 0.
    logits = jnp.dot(h.astype(bf16), w4_ref[...],
                     preferred_element_type=jnp.float32) + b4_ref[...]

    # softmax over the class axis
    m = jnp.max(logits, axis=1, keepdims=True)
    e = jnp.exp(logits - m)
    out_ref[...] = e * pl.reciprocal(jnp.sum(e, axis=1, keepdims=True), approx=True)


# --------------------------------------------------------------------------------------
# Wrapper
# --------------------------------------------------------------------------------------
def combined_classifier_forward(x, params, *, batch_tile=None):
    """x: [B, E] float32. Returns softmax probabilities [B, num_class] (float32)."""
    w1, b1, w2, b2, w3, b3, w4, b4 = params    # [in, out] layout, f32
    del b1  # bottleneck bias cancels exactly in train-mode BatchNorm (gamma=1, beta=0)
    B, E = x.shape
    H = w1.shape[1]            # 2E
    C = w4.shape[1]            # num_class

    f32, bf16 = jnp.float32, jnp.bfloat16
    vmem_limit, default_tile = _vmem_budget()
    if batch_tile is None:
        batch_tile = default_tile

    # Lane-pad feature/class dims to 128 multiples.
    Ep = _round_up(E, 128)
    Hp = _round_up(H, 128)
    Cp = _round_up(C, 128)

    # Adaptive batch tile: multiple of 16 (bf16 sublane packing), minimal padding waste.
    n_tiles = -(-B // batch_tile)
    TB = _round_up(-(-B // n_tiles), 16)
    Bp = TB * n_tiles

    # x is streamed from HBM in both passes -> pad & cast to bf16 once here.
    xp = jnp.zeros((Bp, Ep), bf16).at[:B, :E].set(x.astype(bf16))
    w1p = jnp.zeros((Ep, Hp), bf16).at[:E, :H].set(w1.astype(bf16))
    w2p = jnp.zeros((Hp, Ep), bf16).at[:H, :E].set(w2.astype(bf16))
    b2p = jnp.zeros((1, Ep), f32).at[:, :E].set(b2.astype(f32))
    w3p = jnp.zeros((Ep, Ep), bf16).at[:E, :E].set(w3.astype(bf16))
    b3p = jnp.zeros((1, Ep), f32).at[:, :E].set(b3.astype(f32))
    w4p = jnp.zeros((Ep, Cp), bf16).at[:E, :C].set(w4.astype(bf16))
    # Padded class columns get a huge negative bias so softmax assigns them zero mass.
    b4p = jnp.full((1, Cp), NEG_INF, f32).at[:, :C].set(b4.astype(f32))

    # Constant blocks: fetched once, single-buffered (VMEM-resident across the grid).
    const = lambda shape: pl.BlockSpec(shape, lambda i: (0, 0),
                                       pipeline_mode=pl.Buffered(buffer_count=1))
    x_spec = pl.BlockSpec((TB, Ep), lambda i: (i, 0))

    # ---- pass 1: partial BN statistics per batch tile (fully parallel grid)
    stats = pl.pallas_call(
        _bn_stats_kernel,
        out_shape=jax.ShapeDtypeStruct((8 * n_tiles, Hp), f32),
        grid=(n_tiles,),
        in_specs=[x_spec, const((Ep, Hp))],
        out_specs=pl.BlockSpec((8, Hp), lambda i: (i, 0)),
        compiler_params=pltpu.CompilerParams(
            dimension_semantics=("parallel",),
            vmem_limit_bytes=vmem_limit),
    )(xp, w1p)

    # Finalize BN statistics (tiny [n_tiles, Hp] reduction) and fold mean/rstd into a
    # per-feature affine (bias-free: b1 cancels in train-mode BN with beta=0).
    stats = stats.reshape(n_tiles, 8, Hp)
    sum_h = jnp.sum(stats[:, 0, :], axis=0)
    sumsq_h = jnp.sum(stats[:, 1, :], axis=0)
    mean_h = sum_h / B
    var = jnp.maximum(sumsq_h / B - mean_h * mean_h, 0.0)   # biased variance
    rstd = jax.lax.rsqrt(var + BN_EPS)
    bn_scale = rstd.reshape(1, Hp)
    bn_shift = (-mean_h * rstd).reshape(1, Hp)
    # TODO(synk): single-pass E[h^2]-mean^2 can lose precision for large-mean activations
    # of a *trained* bottleneck; switch to a two-pass mean/var (or running stats) then.

    # ---- pass 2: BN affine + MLP + softmax, batch tiles independent -> "parallel"
    out_p = pl.pallas_call(
        _mlp_kernel,
        out_shape=jax.ShapeDtypeStruct((Bp, Cp), f32),
        grid=(n_tiles,),
        in_specs=[const((1, Hp)), const((1, Hp)), x_spec,
                  const((Ep, Hp)),
                  const((Hp, Ep)), const((1, Ep)),
                  const((Ep, Ep)), const((1, Ep)),
                  const((Ep, Cp)), const((1, Cp))],
        out_specs=pl.BlockSpec((TB, Cp), lambda i: (i, 0)),
        compiler_params=pltpu.CompilerParams(
            dimension_semantics=("parallel",),
            vmem_limit_bytes=vmem_limit),
    )(bn_scale, bn_shift, xp, w1p, w2p, b2p, w3p, b3p, w4p, b4p)

    return out_p[:B, :C]


# --------------------------------------------------------------------------------------
# Parameter construction (matches torch xavier_normal_ on [out, in] weights; zero biases)
# --------------------------------------------------------------------------------------
def _xavier_normal(key, fan_in, fan_out):
    std = math.sqrt(2.0 / (fan_in + fan_out))
    return jax.random.normal(key, (fan_in, fan_out), dtype=jnp.float32) * std


def make_params(key, transformer_dim, num_class):
    E = transformer_dim
    k1, k2, k3, k4 = jax.random.split(key, 4)
    w1 = _xavier_normal(k1, E, 2 * E)
    b1 = jnp.zeros((1, 2 * E), jnp.float32)
    w2 = _xavier_normal(k2, 2 * E, E)
    b2 = jnp.zeros((1, E), jnp.float32)
    w3 = _xavier_normal(k3, E, E)
    b3 = jnp.zeros((1, E), jnp.float32)
    w4 = _xavier_normal(k4, E, num_class)
    b4 = jnp.zeros((1, num_class), jnp.float32)
    return (w1, b1, w2, b2, w3, b3, w4, b4)


def _reference_forward(x, params):
    """Pure-JAX f32 reference for sanity checking (training-mode BatchNorm)."""
    w1, b1, w2, b2, w3, b3, w4, b4 = params
    h = x @ w1 + b1
    mean = jnp.mean(h, axis=0, keepdims=True)
    var = jnp.mean((h - mean) ** 2, axis=0, keepdims=True)
    h = jnp.maximum((h - mean) / jnp.sqrt(var + BN_EPS), 0.0)
    h = jnp.maximum(h @ w2 + b2, 0.0)
    h = jnp.maximum(h @ w3 + b3, 0.0)
    logits = h @ w4 + b4
    return jax.nn.softmax(logits, axis=1)


if __name__ == "__main__":
    key = jax.random.PRNGKey(0)
    kx, kp = jax.random.split(key)

    transformer_dim = 32   # embedding_dim E
    num_class = 4
    batch = 8

    x = jax.random.normal(kx, (batch, transformer_dim), dtype=jnp.float32)
    params = make_params(kp, transformer_dim, num_class)

    out = combined_classifier_forward(x, params)
    out = jax.block_until_ready(out)

    ref = _reference_forward(x, params)
    assert out.shape == (batch, num_class)
    # bf16 matmul inputs + approx reciprocal -> loosened tolerance vs the f32 reference.
    assert jnp.allclose(out, ref, atol=3e-2, rtol=0.0), \
        f"max abs diff {jnp.max(jnp.abs(out - ref))}"
    # rows of a softmax sum to ~1
    assert jnp.allclose(jnp.sum(out, axis=1), 1.0, atol=1e-2)

    print("KERNEL_OK")
</pallas_src>

<mosaic_0001>
module attributes {stable_mosaic.version = 11 : i64} {
  func.func @_bn_stats_kernel(%arg0: i32, %arg1: memref<16x128xbf16, #tpu.memory_space<vmem>>, %arg2: memref<128x128xbf16, #tpu.memory_space<vmem>>, %arg3: memref<8x128xf32, #tpu.memory_space<vmem>>) attributes {dimension_semantics = [#tpu.dimension_semantics<parallel>], iteration_bounds = array<i64: 1>, scalar_prefetch = 0 : i64, scratch_operands = 0 : i64, tpu.core_type = #tpu.core_type<tc>, window_params = [{transform_indices = @transform_0, window_bounds = array<i64: 16, 128>}, {pipeline_mode = #tpu.pipeline_mode<synchronous>, transform_indices = @transform_1, window_bounds = array<i64: 128, 128>}, {transform_indices = @transform_2, window_bounds = array<i64: 8, 128>}]} {
    %c0 = arith.constant 0 : index
    %c0_0 = arith.constant 0 : index
    %0 = vector.load %arg1[%c0, %c0_0] : memref<16x128xbf16, #tpu.memory_space<vmem>>, vector<16x128xbf16>
    %c0_1 = arith.constant 0 : index
    %c0_2 = arith.constant 0 : index
    %1 = vector.load %arg2[%c0_1, %c0_2] : memref<128x128xbf16, #tpu.memory_space<vmem>>, vector<128x128xbf16>
    %cst = arith.constant dense<0.000000e+00> : vector<16x128xf32>
    %2 = tpu.matmul %0, %1, %cst {dimension_numbers = #tpu.dot_dimension_numbers<[1], [0], [0], [1], [0, 0, 1, 1], [], []>} : vector<16x128xbf16>, vector<128x128xbf16>, vector<16x128xf32> -> vector<16x128xf32>
    %cst_3 = arith.constant dense<0.000000e+00> : vector<128xf32>
    %3 = vector.multi_reduction <add>, %2, %cst_3 [0] : vector<16x128xf32> to vector<128xf32>
    %4 = vector.shape_cast %3 : vector<128xf32> to vector<1x128xf32>
    %5 = arith.mulf %2, %2 : vector<16x128xf32>
    %cst_4 = arith.constant dense<0.000000e+00> : vector<128xf32>
    %6 = vector.multi_reduction <add>, %5, %cst_4 [0] : vector<16x128xf32> to vector<128xf32>
    %7 = vector.shape_cast %6 : vector<128xf32> to vector<1x128xf32>
    %8 = tpu.iota {dimensions = array<i32: 0>} : vector<8x128xi32>
    %c0_i32 = arith.constant 0 : i32
    %9 = vector.broadcast %c0_i32 : i32 to vector<8x128xi32>
    %10 = arith.cmpi eq, %8, %9 : vector<8x128xi32>
    %c1_i32 = arith.constant 1 : i32
    %11 = vector.broadcast %c1_i32 : i32 to vector<8x128xi32>
    %12 = arith.cmpi eq, %8, %11 : vector<8x128xi32>
    %cst_5 = arith.constant 0.000000e+00 : f32
    %13 = vector.shape_cast %7 : vector<1x128xf32> to vector<1x128xf32>
    %14 = vector.broadcast %13 : vector<1x128xf32> to vector<8x128xf32>
    %15 = vector.broadcast %cst_5 : f32 to vector<8x128xf32>
    %16 = arith.select %12, %14, %15 : vector<8x128xi1>, vector<8x128xf32>
    %17 = vector.shape_cast %4 : vector<1x128xf32> to vector<1x128xf32>
    %18 = vector.broadcast %17 : vector<1x128xf32> to vector<8x128xf32>
    %19 = arith.select %10, %18, %16 : vector<8x128xi1>, vector<8x128xf32>
    %c0_6 = arith.constant 0 : index
    %c0_7 = arith.constant 0 : index
    %20 = vector.load %arg3[%c0_6, %c0_7] : memref<8x128xf32, #tpu.memory_space<vmem>>, vector<8x128xf32>
    tpu.vector_store %arg3[%c0_6, %c0_7], %19 {strides = array<i32>} : memref<8x128xf32, #tpu.memory_space<vmem>>, vector<8x128xf32>,
    return
  }
  func.func @transform_0(%arg0: i32) -> (i32, i32) {
    %c0_i32 = arith.constant 0 : i32
    %c0_i32_0 = arith.constant 0 : i32
    return %arg0, %c0_i32 : i32, i32
  }
  func.func @transform_1(%arg0: i32) -> (i32, i32) {
    %c0_i32 = arith.constant 0 : i32
    %c0_i32_0 = arith.constant 0 : i32
    %c0_i32_1 = arith.constant 0 : i32
    return %c0_i32, %c0_i32_0 : i32, i32
  }
  func.func @transform_2(%arg0: i32) -> (i32, i32) {
    %c0_i32 = arith.constant 0 : i32
    %c0_i32_0 = arith.constant 0 : i32
    return %arg0, %c0_i32 : i32, i32
  }
}

</mosaic_0001>

<bundles_post_ra>
// kernel: tpu_custom_call.1
= control target key start
LH: loop header
LB: loop body
LE: loop exit
PB: predicated region body
PF: predicated region fallthrough
CT: control target
= control target key end

     0   :  { %7 = vsyncpa [#allocation3], 0  ;;  %s328_s0 = inlined_call_operand.hbm [shape: bf16[16,128], index: 0, kind: input, shape index: {}]   ;;  %s329_s1 = inlined_call_operand.hbm [shape: bf16[128,128], index: 1, kind: input, shape index: {}]   ;;  %s330_s2 = inlined_call_operand.hbm [shape: f32[8,128], index: 2, kind: output, shape index: {}]  }
   0x1   :  { %8 = vsyncpa [#allocation6], 0 }
   0x2   :  { %9 = vsyncpa [#allocation4], 0  ;;  %s14_s11 = sshll.u32 %s328_s0, 4  ;;  %s299_s12 = smov [#allocation2]   ;;  %s15_s11 = int_to_ptr.hbm [resolvable:$true] %s14_s11 }
   0x3   :  { %s16_s13 = sshll.u32 %s299_s12, 4  ;;  %s27_s16 = sshll.u32 %s329_s1, 4  ;;  %s17_s13 = int_to_ptr.vmem [resolvable:$true] %s16_s13  ;;  %s28_s16 = int_to_ptr.hbm [resolvable:$true] %s27_s16 }
   0x4   :  { %s300_s17 = smov 64   ;;  %s301_s18 = smov 4  }
   0x5   :  { %22 = dma.hbm_to_vmem [thread:$0]  %s15_s11, 128, %s17_s13, [#allocation3], %s300_s17, %s300_s17, %s301_s18  }
   0x6   :  { %s302_s19 = smov [#allocation5]  }
   0x7   :  { %s29_s20 = sshll.u32 %s302_s19, 4  ;;  %s30_s20 = int_to_ptr.vmem [resolvable:$true] %s29_s20 }
   0x8   :  { %35 = dma.hbm_to_vmem [thread:$0]  %s28_s16, 1024, %s30_s20, [#allocation6], %s300_s17, %s300_s17, %s301_s18  }
   0x9   :  { %293 = dma.done.wait [#allocation3], 128  }
   0xa   :  { %294 = vsyncadd [#allocation3], 4294967168 }
   0xb   :  { %295 = dma.done.wait [#allocation6], 1024  }
   0xc   :  { %296 = vsyncadd [#allocation6], 4294966272  ;;  %v215_v0 = vld [vmem:[#allocation5 + $0x38] sm:$0xff]  ;;  %v214_v1 = vld [vmem:[#allocation5 + $0x30] sm:$0xff]  ;;  %v146_v18 = vlaneseq  ;;  %s303_s0 = smov [#allocation7]   ;;  %s160_s23 = sshll.u32 %s330_s2, 4  ;;  %s161_s23 = int_to_ptr.hbm [resolvable:$true] %s160_s23 }
   0xd   :  { %116 = vmatpush.bf16.msra.mxu0 %v215_v0  ;;  %v213_v2 = vld [vmem:[#allocation5 + $0x28] sm:$0xff]  ;;  %v212_v3 = vld [vmem:[#allocation5 + $0x20] sm:$0xff]  ;;  %v211_v4 = vld [vmem:[#allocation5 + $0x18] sm:$0xff]  ;;  %s158_s1 = sshll.u32 %s303_s0, 4  ;;  %s159_s1 = int_to_ptr.vmem [resolvable:$true] %s158_s1 }
   0xe   :  { %v210_v5 = vld [vmem:[#allocation5 + $0x10] sm:$0xff]  ;;  %v209_v6 = vld [vmem:[#allocation5 + $0x8] sm:$0xff]  ;;  %v208_v7 = vld [vmem:[#allocation5] sm:$0xff]  ;;  %v147_v23 = vshrl.u32 %v146_v18, 7 }
   0xf   :  { %v207_v8 = vld [vmem:[#allocation2] sm:$0xff] }
  0x10   :  { %vm149_vm0 = vcmp.eq.s32.totalorder %v147_v23, 1  ;;  %vm148_vm1 = vcmp.eq.s32.totalorder %v147_v23, 0 }
  0x11   :  { %117 = vmatpush.bf16.msra.mxu0 %v214_v1 }
  0x15   :  { %118 = vmatpush.bf16.msra.mxu0 %v213_v2 }
  0x19   :  { %119 = vmatpush.bf16.msra.mxu0 %v212_v3 }
  0x1d   :  { %120 = vmatpush.bf16.msra.mxu0 %v211_v4 }
  0x21   :  { %121 = vmatpush.bf16.msra.mxu0 %v210_v5 }
  0x25   :  { %122 = vmatpush.bf16.msra.mxu0 %v209_v6 }
  0x29   :  { %123 = vmatpush.bf16.msra.mxu0 %v208_v7 }
  0x2c   :  { %124 = vmatmul.bf16.vlgmr.msra.gmra.mxu0 %v207_v8 }
  0xa9   :  { %v125_v9 = vpop.f32.mrf.mxu0 }
  0xaa   :  { %v137_v11 = vmul.f32 %v125_v9, %v125_v9 }
  0xb1   :  { %v127_v10 = vpop.f32.mrf.mxu0 }
  0xb2   :  { %v130_v12 = vadd.f32 %v127_v10, %v125_v9  ;;  %v138_v13 = vmul.f32 %v127_v10, %v127_v10 }
  0xb4   :  { %v131_v14 = vrot.slane %v130_v12, 4  ;;  %v139_v15 = vadd.f32 %v138_v13, %v137_v11 }
  0xb6   :  { %v132_v16 = vadd.f32 %v131_v14, %v130_v12  ;;  %v140_v17 = vrot.slane %v139_v15, 4 }
  0xb8   :  { %v133_v19 = vrot.slane %v132_v16, 2  ;;  %v141_v20 = vadd.f32 %v140_v17, %v139_v15 }
  0xba   :  { %v134_v21 = vadd.f32 %v133_v19, %v132_v16  ;;  %v142_v22 = vrot.slane %v141_v20, 2 }
  0xbc   :  { %v143_v24 = vadd.f32 %v142_v22, %v141_v20  ;;  %v135_v25 = vrot.slane %v134_v21, 1 }
  0xbe   :  { %v144_v26 = vrot.slane %v143_v24, 1  ;;  %v136_v28 = vadd.f32 %v135_v25, %v134_v21 }
  0xc0   :  { %v145_v27 = vadd.f32 %v144_v26, %v143_v24 }
  0xc2   :  { %v150_v29 = vsel %vm149_vm0, %v145_v27, 0.0 }
  0xc3   :  { %v151_v30 = vsel %vm148_vm1, %v136_v28, %v150_v29 }
  0xc4   :  { %152 = vst [vmem:[#allocation7] sm:$0xff] %v151_v30 }
  0xc5   :  { %163 = dma.vmem_to_hbm [thread:$0]  %s159_s1, 128, %s161_s23, [#allocation4]  }
  0xc6   :  { %297 = dma.done.wait [#allocation4], 128  }
  0xc7   :  { %298 = vsyncadd [#allocation4], 4294967168 }
  0xc8   :  { %168 = vsyncpa [#allocation3], 1 }
  0xc9   :  { %169 = vsyncpa [#allocation6], 1 }
  0xca   :  { %170 = vsyncpa [#allocation4], 1 }

</bundles_post_ra>
